<compile_context>
chip_gen: v7x
topology: tpu7x:2x2x1
jax: 0.10.0
libtpu: 0.0.40
codegen_flags: <defaults>
</compile_context>

<pallas_src>
import math
import numpy as np
import jax
import jax.numpy as jnp
from jax.experimental import pallas as pl
from jax.experimental.pallas import tpu as pltpu


def _get_rotary_vectors(n_ropes, d_head, rope_coef):
    sin = np.zeros((n_ropes, d_head), dtype=np.float32)
    cos = np.zeros((n_ropes, d_head), dtype=np.float32)
    for position in range(n_ropes):
        for i in range(d_head // 2):
            theta = 10000.0 ** (-2.0 * (i - 1) / d_head)
            m_theta = position * theta * rope_coef
            cos[position, 2 * i] = np.cos(m_theta)
            cos[position, 2 * i + 1] = np.cos(m_theta)
            sin[position, 2 * i] = -np.sin(m_theta)
            sin[position, 2 * i + 1] = np.cos(m_theta)
    return sin, cos


def _rope_attn_head_kernel(x_ref, w_ref, b_ref, cos_ref, sin_ref, o_ref):
    seq, d_head = o_ref.shape

    # One fused projection matmul (bf16 operands, f32 accumulation) yields
    # [q*scale | q_shuf*scale | k | k_shuf | v] in a single MXU pass.
    # (The 1/sqrt(d_head) softmax scale is pre-baked into the q weights/bias.)
    proj = jnp.dot(x_ref[...], w_ref[...],
                   preferred_element_type=jnp.float32) + b_ref[...]
    q  = proj[:, 0 * d_head:1 * d_head]
    qs = proj[:, 1 * d_head:2 * d_head]
    k  = proj[:, 2 * d_head:3 * d_head]
    ks = proj[:, 3 * d_head:4 * d_head]
    v  = proj[:, 4 * d_head:5 * d_head]

    # "RoPE" with the module's aliased-swap semantics: rotated = orig*cos + shuffled*sin.
    # (f32 elementwise on the VPU; no MXU / XLU work.)
    cos = cos_ref[...]
    sin = sin_ref[...]
    q_rot = q * cos + qs * sin          # already carries the 1/sqrt(d_head) scale
    k_rot = k * cos + ks * sin

    # Scaled-dot-product scores (scale already folded into q_rot).
    s = jax.lax.dot_general(
        q_rot.astype(jnp.bfloat16), k_rot.astype(jnp.bfloat16),
        dimension_numbers=(((1,), (1,)), ((), ())),
        preferred_element_type=jnp.float32)

    # In-kernel causal mask: two iota compares + one select (no O(N^2) HBM bias).
    row = jax.lax.broadcasted_iota(jnp.int32, s.shape, 0)
    col = jax.lax.broadcasted_iota(jnp.int32, s.shape, 1)
    s = jnp.where(row >= col, s, -1e30)

    # Softmax with EUP approximate reciprocal (diagonal is always kept -> denom > 0).
    m = jnp.max(s, axis=-1, keepdims=True)
    e = jnp.exp(s - m)
    p = e * pl.reciprocal(jnp.sum(e, axis=-1, keepdims=True), approx=True)

    o_ref[...] = jnp.dot(p.astype(jnp.bfloat16), v.astype(jnp.bfloat16),
                         preferred_element_type=jnp.float32).astype(o_ref.dtype)


def rope_masked_attention_head(x, wq, bq, wk, bk, wv, bv, sin_full, cos_full):
    b, seq, d_model = x.shape
    d_head = wq.shape[1]
    assert seq <= cos_full.shape[0] and seq <= sin_full.shape[0], \
        "seq_len exceeds n_ropes (rotary tables too short)"

    scale = 1.0 / math.sqrt(d_head)

    # Column permutation implementing the aliased-view swap:
    #   shuffled[:, j] = q[:, j+1] for even j, q[:, j] for odd j.
    # Folded into the weights (q is linear in x), so no in-kernel shuffle is needed.
    idx = np.arange(d_head)
    src = np.where(idx % 2 == 0, idx + 1, idx)

    # Bake the 1/sqrt(d_head) softmax scale into the q path (RoPE is linear in q, so
    # scaling q and q_shuf scales q_rot), removing the N^2 scale multiply entirely.
    wq_sc, bq_sc = wq * scale, bq * scale
    wq_s, bq_s = wq_sc[:, src], bq_sc[src]
    wk_s, bk_s = wk[:, src], bk[src]

    # Fused projection weights/bias. Weights + activations go to the MXU in bf16
    # (halves their DMA); biases stay f32 and are added to the f32 accumulator.
    w_all = jnp.concatenate([wq_sc, wq_s, wk, wk_s, wv], axis=1).astype(jnp.bfloat16)
    b_all = jnp.concatenate([bq_sc, bq_s, bk, bk_s, bv]).reshape(1, 5 * d_head)
    b_all = b_all.astype(jnp.float32)

    # Rotary tables passed ONCE at (seq, d_head); the index_map reuses the same block
    # for every batch step (no host-side tile across the batch).
    cos_t = cos_full[:seq].astype(jnp.float32)
    sin_t = sin_full[:seq].astype(jnp.float32)

    x_bf16 = x.astype(jnp.bfloat16)
    out_dtype = x.dtype

    # Advisory cost estimate for XLA's scheduler.
    flops_per_batch = (2 * seq * d_model * 5 * d_head      # fused projection
                       + 2 * seq * seq * d_head            # QK^T
                       + 2 * seq * seq * d_head            # PV
                       + 6 * seq * d_head)                 # RoPE elementwise
    bytes_accessed = (x_bf16.size * 2 + w_all.size * 2 + b_all.size * 4
                      + cos_t.size * 4 + sin_t.size * 4
                      + b * seq * d_head * np.dtype(out_dtype).itemsize)
    cost = pl.CostEstimate(
        flops=int(b * flops_per_batch),
        transcendentals=int(b * (seq * seq + seq)),
        bytes_accessed=int(bytes_accessed),
    )

    # Scoped-VMEM limit sized from the actual per-step buffers (with generous headroom
    # for double-buffering, (8,128) padding and intermediates).
    block_bytes = (seq * d_model * 2            # x tile (bf16)
                   + w_all.size * 2             # fused weights (bf16)
                   + b_all.size * 4             # bias (f32)
                   + cos_t.size * 4 + sin_t.size * 4
                   + seq * d_head * np.dtype(out_dtype).itemsize)
    vmem_limit = int(min(max(32 * block_bytes, 4 * 1024 * 1024), 128 * 1024 * 1024))

    out = pl.pallas_call(
        _rope_attn_head_kernel,
        out_shape=jax.ShapeDtypeStruct((b, seq, d_head), out_dtype),
        grid=(b,),
        in_specs=[
            pl.BlockSpec((None, seq, d_model), lambda i: (i, 0, 0)),   # x: one batch/step
            pl.BlockSpec((d_model, 5 * d_head), lambda i: (0, 0)),     # fused weights
            pl.BlockSpec((1, 5 * d_head), lambda i: (0, 0)),           # fused bias
            pl.BlockSpec((seq, d_head), lambda i: (0, 0)),             # cos (shared)
            pl.BlockSpec((seq, d_head), lambda i: (0, 0)),             # sin (shared)
        ],
        out_specs=pl.BlockSpec((None, seq, d_head), lambda i: (i, 0, 0)),
        compiler_params=pltpu.CompilerParams(
            dimension_semantics=("parallel",),      # megacore sharding on v7x
            vmem_limit_bytes=vmem_limit),
        cost_estimate=cost,
    )(x_bf16, w_all, b_all, cos_t, sin_t)

    # TODO(synk): at production seq, replace the per-batch monolithic body with a
    # flash-style Q ("parallel") x KV ("arbitrary") tiling + (m, l, acc) scratch.
    return out


def _reference(x, wq, bq, wk, bk, wv, bv, sin, cos):
    # Pure-JAX f32 replication of the PyTorch forward (with the aliased-view swap semantics).
    q = x @ wq + bq
    k = x @ wk + bk
    v = x @ wv + bv

    def shuf(t):
        odd = t[..., 1::2]
        return jnp.stack([odd, odd], axis=-1).reshape(t.shape)

    q_rot = q * cos + shuf(q) * sin
    k_rot = k * cos + shuf(k) * sin
    scale = 1.0 / math.sqrt(q.shape[-1])
    s = jnp.einsum('bqd,bkd->bqk', q_rot, k_rot) * scale
    seq = q.shape[1]
    mask = jnp.tril(jnp.ones((seq, seq), dtype=bool))
    s = jnp.where(mask, s, -jnp.inf)
    p = jax.nn.softmax(s, axis=-1)
    return jnp.einsum('bqk,bkd->bqd', p, v)


if __name__ == "__main__":
    # Module hyperparameters (small, consistent with the forward pass).
    d_model, d_head, n_ropes, rope_coef = 32, 16, 16, 1.0
    b, seq = 2, 8

    key = jax.random.PRNGKey(0)
    kx, kq, kbq, kk, kbk, kv, kbv = jax.random.split(key, 7)

    x = jax.random.normal(kx, (b, seq, d_model), dtype=jnp.float32)

    # nn.Linear(d_model, d_head): weight (d_head, d_model), bias (d_head,), uniform init.
    bound = 1.0 / math.sqrt(d_model)
    wq = jax.random.uniform(kq, (d_head, d_model), jnp.float32, -bound, bound).T
    bq = jax.random.uniform(kbq, (d_head,), jnp.float32, -bound, bound)
    wk = jax.random.uniform(kk, (d_head, d_model), jnp.float32, -bound, bound).T
    bk = jax.random.uniform(kbk, (d_head,), jnp.float32, -bound, bound)
    wv = jax.random.uniform(kv, (d_head, d_model), jnp.float32, -bound, bound).T
    bv = jax.random.uniform(kbv, (d_head,), jnp.float32, -bound, bound)

    sin_np, cos_np = _get_rotary_vectors(n_ropes, d_head, rope_coef)
    sin_full = jnp.asarray(sin_np)
    cos_full = jnp.asarray(cos_np)

    out = rope_masked_attention_head(x, wq, bq, wk, bk, wv, bv, sin_full, cos_full)
    out = jax.block_until_ready(out)

    ref = _reference(x, wq, bq, wk, bk, wv, bv, sin_full[:seq], cos_full[:seq])
    # Tolerance is looser than a pure-f32 path because the kernel deliberately feeds bf16
    # operands to the MXU (f32 accumulation) and uses the approximate EUP reciprocal, per
    # the performance review; genuine bugs (wrong shuffle/mask/scale) produce O(0.1-1) errors.
    np.testing.assert_allclose(np.asarray(out), np.asarray(ref), rtol=3e-2, atol=3e-2)

    print("KERNEL_OK")
</pallas_src>

<mosaic_0001>
module attributes {stable_mosaic.version = 11 : i64} {
  func.func @_rope_attn_head_kernel(%arg0: i32, %arg1: memref<1x8x32xbf16, #tpu.memory_space<vmem>>, %arg2: memref<32x80xbf16, #tpu.memory_space<vmem>>, %arg3: memref<1x80xf32, #tpu.memory_space<vmem>>, %arg4: memref<8x16xf32, #tpu.memory_space<vmem>>, %arg5: memref<8x16xf32, #tpu.memory_space<vmem>>, %arg6: memref<1x8x16xf32, #tpu.memory_space<vmem>>) attributes {dimension_semantics = [#tpu.dimension_semantics<parallel>], iteration_bounds = array<i64: 2>, scalar_prefetch = 0 : i64, scratch_operands = 0 : i64, tpu.core_type = #tpu.core_type<tc>, window_params = [{transform_indices = @transform_0, window_bounds = array<i64: 1, 8, 32>}, {pipeline_mode = #tpu.pipeline_mode<synchronous>, transform_indices = @transform_1, window_bounds = array<i64: 32, 80>}, {pipeline_mode = #tpu.pipeline_mode<synchronous>, transform_indices = @transform_2, window_bounds = array<i64: 1, 80>}, {pipeline_mode = #tpu.pipeline_mode<synchronous>, transform_indices = @transform_3, window_bounds = array<i64: 8, 16>}, {pipeline_mode = #tpu.pipeline_mode<synchronous>, transform_indices = @transform_4, window_bounds = array<i64: 8, 16>}, {transform_indices = @transform_5, window_bounds = array<i64: 1, 8, 16>}]} {
    %c0 = arith.constant 0 : index
    %c0_0 = arith.constant 0 : index
    %c0_1 = arith.constant 0 : index
    %0 = vector.load %arg1[%c0, %c0_0, %c0_1] : memref<1x8x32xbf16, #tpu.memory_space<vmem>>, vector<1x8x32xbf16>
    %1 = vector.shape_cast %0 : vector<1x8x32xbf16> to vector<8x32xbf16>
    %c0_2 = arith.constant 0 : index
    %c0_3 = arith.constant 0 : index
    %2 = vector.load %arg2[%c0_2, %c0_3] : memref<32x80xbf16, #tpu.memory_space<vmem>>, vector<32x80xbf16>
    %cst = arith.constant dense<0.000000e+00> : vector<8x80xf32>
    %3 = tpu.matmul %1, %2, %cst {dimension_numbers = #tpu.dot_dimension_numbers<[1], [0], [0], [1], [0, 0, 1, 1], [], []>} : vector<8x32xbf16>, vector<32x80xbf16>, vector<8x80xf32> -> vector<8x80xf32>
    %c0_4 = arith.constant 0 : index
    %c0_5 = arith.constant 0 : index
    %4 = vector.load %arg3[%c0_4, %c0_5] : memref<1x80xf32, #tpu.memory_space<vmem>>, vector<1x80xf32>
    %5 = vector.broadcast %4 : vector<1x80xf32> to vector<8x80xf32>
    %6 = arith.addf %3, %5 : vector<8x80xf32>
    %7 = vector.extract_strided_slice %6 {offsets = [0, 0], sizes = [8, 16], strides = [1, 1]} : vector<8x80xf32> to vector<8x16xf32>
    %8 = vector.extract_strided_slice %6 {offsets = [0, 16], sizes = [8, 16], strides = [1, 1]} : vector<8x80xf32> to vector<8x16xf32>
    %9 = vector.extract_strided_slice %6 {offsets = [0, 32], sizes = [8, 16], strides = [1, 1]} : vector<8x80xf32> to vector<8x16xf32>
    %10 = vector.extract_strided_slice %6 {offsets = [0, 48], sizes = [8, 16], strides = [1, 1]} : vector<8x80xf32> to vector<8x16xf32>
    %11 = vector.extract_strided_slice %6 {offsets = [0, 64], sizes = [8, 16], strides = [1, 1]} : vector<8x80xf32> to vector<8x16xf32>
    %c0_6 = arith.constant 0 : index
    %c0_7 = arith.constant 0 : index
    %12 = vector.load %arg4[%c0_6, %c0_7] : memref<8x16xf32, #tpu.memory_space<vmem>>, vector<8x16xf32>
    %c0_8 = arith.constant 0 : index
    %c0_9 = arith.constant 0 : index
    %13 = vector.load %arg5[%c0_8, %c0_9] : memref<8x16xf32, #tpu.memory_space<vmem>>, vector<8x16xf32>
    %14 = arith.mulf %7, %12 : vector<8x16xf32>
    %15 = arith.mulf %8, %13 : vector<8x16xf32>
    %16 = arith.addf %14, %15 : vector<8x16xf32>
    %17 = arith.mulf %9, %12 : vector<8x16xf32>
    %18 = arith.mulf %10, %13 : vector<8x16xf32>
    %19 = arith.addf %17, %18 : vector<8x16xf32>
    %20 = arith.truncf %16 : vector<8x16xf32> to vector<8x16xbf16>
    %21 = arith.truncf %19 : vector<8x16xf32> to vector<8x16xbf16>
    %cst_10 = arith.constant dense<0.000000e+00> : vector<8x8xf32>
    %22 = tpu.matmul %20, %21, %cst_10 {dimension_numbers = #tpu.dot_dimension_numbers<[1], [1], [0], [0], [0, 0, 1, 0], [], []>} : vector<8x16xbf16>, vector<8x16xbf16>, vector<8x8xf32> -> vector<8x8xf32>
    %23 = tpu.iota {dimensions = array<i32: 0>} : vector<8x8xi32>
    %24 = tpu.iota {dimensions = array<i32: 1>} : vector<8x8xi32>
    %25 = arith.cmpi sge, %23, %24 : vector<8x8xi32>
    %cst_11 = arith.constant -1.000000e+30 : f32
    %26 = vector.broadcast %cst_11 : f32 to vector<8x8xf32>
    %27 = arith.select %25, %22, %26 : vector<8x8xi1>, vector<8x8xf32>
    %cst_12 = arith.constant dense<0xFF800000> : vector<8xf32>
    %28 = vector.multi_reduction <maximumf>, %27, %cst_12 [1] : vector<8x8xf32> to vector<8xf32>
    %29 = vector.shape_cast %28 : vector<8xf32> to vector<8x1xf32>
    %30 = vector.broadcast %29 : vector<8x1xf32> to vector<8x8xf32>
    %31 = arith.subf %27, %30 : vector<8x8xf32>
    %32 = math.exp %31 : vector<8x8xf32>
    %cst_13 = arith.constant dense<0.000000e+00> : vector<8xf32>
    %33 = vector.multi_reduction <add>, %32, %cst_13 [1] : vector<8x8xf32> to vector<8xf32>
    %34 = vector.shape_cast %33 : vector<8xf32> to vector<8x1xf32>
    %35 = tpu.reciprocal %34 {approx = true} : vector<8x1xf32> -> vector<8x1xf32>
    %36 = vector.broadcast %35 : vector<8x1xf32> to vector<8x8xf32>
    %37 = arith.mulf %32, %36 : vector<8x8xf32>
    %38 = arith.truncf %37 : vector<8x8xf32> to vector<8x8xbf16>
    %39 = arith.truncf %11 : vector<8x16xf32> to vector<8x16xbf16>
    %cst_14 = arith.constant dense<0.000000e+00> : vector<8x16xf32>
    %40 = tpu.matmul %38, %39, %cst_14 {dimension_numbers = #tpu.dot_dimension_numbers<[1], [0], [0], [1], [0, 0, 1, 1], [], []>} : vector<8x8xbf16>, vector<8x16xbf16>, vector<8x16xf32> -> vector<8x16xf32>
    %c0_15 = arith.constant 0 : index
    %c0_16 = arith.constant 0 : index
    %c0_17 = arith.constant 0 : index
    %41 = vector.load %arg6[%c0_15, %c0_16, %c0_17] : memref<1x8x16xf32, #tpu.memory_space<vmem>>, vector<1x8x16xf32>
    %42 = vector.shape_cast %41 : vector<1x8x16xf32> to vector<8x16xf32>
    %43 = vector.shape_cast %40 : vector<8x16xf32> to vector<1x8x16xf32>
    tpu.vector_store %arg6[%c0_15, %c0_16, %c0_17], %43 {strides = array<i32>} : memref<1x8x16xf32, #tpu.memory_space<vmem>>, vector<1x8x16xf32>,
    return
  }
  func.func @transform_0(%arg0: i32) -> (i32, i32, i32) {
    %c0_i32 = arith.constant 0 : i32
    %c0_i32_0 = arith.constant 0 : i32
    %c0_i32_1 = arith.constant 0 : i32
    return %arg0, %c0_i32, %c0_i32_0 : i32, i32, i32
  }
  func.func @transform_1(%arg0: i32) -> (i32, i32) {
    %c0_i32 = arith.constant 0 : i32
    %c0_i32_0 = arith.constant 0 : i32
    %c0_i32_1 = arith.constant 0 : i32
    return %c0_i32, %c0_i32_0 : i32, i32
  }
  func.func @transform_2(%arg0: i32) -> (i32, i32) {
    %c0_i32 = arith.constant 0 : i32
    %c0_i32_0 = arith.constant 0 : i32
    %c0_i32_1 = arith.constant 0 : i32
    return %c0_i32, %c0_i32_0 : i32, i32
  }
  func.func @transform_3(%arg0: i32) -> (i32, i32) {
    %c0_i32 = arith.constant 0 : i32
    %c0_i32_0 = arith.constant 0 : i32
    %c0_i32_1 = arith.constant 0 : i32
    return %c0_i32, %c0_i32_0 : i32, i32
  }
  func.func @transform_4(%arg0: i32) -> (i32, i32) {
    %c0_i32 = arith.constant 0 : i32
    %c0_i32_0 = arith.constant 0 : i32
    %c0_i32_1 = arith.constant 0 : i32
    return %c0_i32, %c0_i32_0 : i32, i32
  }
  func.func @transform_5(%arg0: i32) -> (i32, i32, i32) {
    %c0_i32 = arith.constant 0 : i32
    %c0_i32_0 = arith.constant 0 : i32
    %c0_i32_1 = arith.constant 0 : i32
    return %arg0, %c0_i32, %c0_i32_0 : i32, i32, i32
  }
}

</mosaic_0001>

<bundles_post_ra>
// kernel: tpu_custom_call.1
= control target key start
LH: loop header
LB: loop body
LE: loop exit
PB: predicated region body
PF: predicated region fallthrough
CT: control target
= control target key end

     0   :  { %10 = vsyncpa [#allocation3], 0  ;;  %s1168_s0 = inlined_call_operand.hbm [shape: bf16[2,8,32], index: 0, kind: input, shape index: {}]   ;;  %s1169_s1 = inlined_call_operand.hbm [shape: bf16[32,80], index: 1, kind: input, shape index: {}]   ;;  %s1170_s2 = inlined_call_operand.vmem [shape: f32[1,80], index: 2, kind: input, shape index: {}]   ;;  %s1171_s3 = inlined_call_operand.vmem [shape: f32[8,16], index: 3, kind: input, shape index: {}]   ;;  %s1172_s4 = inlined_call_operand.hbm [shape: f32[8,16], index: 4, kind: input, shape index: {}]   ;;  %s1173_s5 = inlined_call_operand.hbm [shape: f32[2,8,16], index: 5, kind: output, shape index: {}]  }
   0x1   :  { %12 = vsyncpa [#allocation3 + $0x1], 0 }
   0x2   :  { %13 = vsyncpa [#allocation6], 0 }
   0x3   :  { %14 = vsyncpa [#allocation4], 0 }
   0x4   :  { %16 = vsyncpa [#allocation4 + $0x1], 0  ;;  %s923_s18 = smov 0   ;;  %s925_s19 = smov 0  }
   0x5   :  { %s927_s20 = smov 0   ;;  %s929_s21 = smov 0  }
   0x6 LB: > { %s944_s22 = sadd.s32 4294967295, %s877_s21   ;;  %s589_s23 = sadd.s32 4294967294, %s877_s21   ;;  %s877_s21 = sphi %s929_s21, %s1193_s21   ;;  %s873_s20 = sphi %s927_s20, %s1192_s20   ;;  %s869_s19 = sphi %s925_s19, %s1191_s19   ;;  %s865_s18 = sphi %s923_s18, %s1190_s18  }
   0x7   : > { %p42_p0 = scmp.ne.s32.totalorder %s869_s19, %s865_s18  ;;  %p1174_p1 = scmp.eq.s32.totalorder %s944_s22, 0 }
   0x8   : > { %p156_p3 = scmp.eq.s32.totalorder %s589_s23, 1  ;;  %p590_p5 = scmp.ge.s32.totalorder %s877_s21, 1 }
   0x9   : > { %p953_p4 = por %p1174_p1, %p42_p0  ;;  %p163_p7 = scmp.lt.s32.totalorder %s877_s21, 3 }
   0xa   : > { %p958_p6 = por %p156_p3, %p42_p0  ;;  %s879_s27 = smov [#allocation5]  }
   0xb   : > { %s1177_s24 = scalar_select %p953_p4, 1, 0 }
   0xc   : > { %s1178_s25 = scalar_select %p958_p6, 1, 0 }
   0xd   : > { %p963_p8 = pnand %p590_p5, %p163_p7  ;;  %s175_s28 = sshll.u32 %s879_s27, 4  ;;  %s967_s28 = int_to_ptr.vmem [resolvable:$true] %s175_s28 }
   0xe   : > { %s880_s30 = smov [#allocation7]   ;;  %s721_s9 = scalar_lea.hbm %s1169_s1, 256 }
   0xf   : > { %p650_p9 = pneg %p963_p8  ;;  %s195_s6 = sshll.u32 %s880_s30, 4  ;;  %s978_s6 = int_to_ptr.vmem [resolvable:$true] %s195_s6 }
  0x10   : > { %p722_p12 = scmp.ne.s32.totalorder %s1169_s1, %s721_s9  ;;  %p728_p5 = scmp.lt.u32.totalorder %s721_s9, %s1169_s1 }
  0x11   : > { %p974_p11 = pnand %p650_p9, %p1174_p1 }
  0x13   : > { %p723_p13 = pneg %p974_p11 }
  0x15   : > { %p724_p0 = pnand %p723_p13, %p722_p12 }
  0x17   : > { %p725_p3 = pneg %p724_p0 }
  0x19   : > { %p730_p7 = pnand %p728_p5, %p725_p3 }
  0x1b   : > { %733 = shalt.err (!%p730_p7)
}
  0x1c   : > { %s734_s14 = scalar_lea.vmem %s967_s28, 256  ;;  %p742_p2 = scmp.lt.s32.totalorder %s967_s28, %s967_s28 }
  0x1d   : > { %p735_p9 = scmp.ne.s32.totalorder %s967_s28, %s734_s14  ;;  %p743_p12 = scmp.lt.s32.totalorder %s734_s14, %s734_s14 }
  0x1f   : > { %p737_p10 = pnand %p735_p9, %p723_p13  ;;  %p744_p0 = por %p743_p12, %p742_p2 }
  0x21   : > { %p738_p1 = pneg %p737_p10 }
  0x23   : > { %p745_p6 = pnand %p744_p0, %p738_p1 }
  0x25   : > { %748 = shalt.err (!%p745_p6)
}
  0x26   : > { %s881_s15 = smov 64   ;;  %s882_s16 = smov 4  }
  0x27   : > { %653 = dma.hbm_to_vmem [thread:$0]  (!%p974_p11), %s1169_s1, 256, %s967_s28, [#allocation6], %s881_s15, %s881_s15, %s882_s16  }
  0x28   : > { %s749_s7 = scalar_lea.hbm %s1172_s4, 128 }
  0x29   : > { %p750_p2 = scmp.ne.s32.totalorder %s1172_s4, %s749_s7  ;;  %p756_p10 = scmp.lt.u32.totalorder %s749_s7, %s1172_s4 }
  0x2b   : > { %p752_p1 = pnand %p750_p2, %p723_p13 }
  0x2d   : > { %p753_p6 = pneg %p752_p1 }
  0x2f   : > { %p758_p3 = pnand %p756_p10, %p753_p6 }
  0x31   : > { %761 = shalt.err (!%p758_p3)
}
  0x32   : > { %s762_s28 = scalar_lea.vmem %s978_s6, 128  ;;  %p770_p12 = scmp.lt.s32.totalorder %s978_s6, %s978_s6 }
  0x33   : > { %p763_p5 = scmp.ne.s32.totalorder %s978_s6, %s762_s28  ;;  %p771_p0 = scmp.lt.s32.totalorder %s762_s28, %s762_s28 }
  0x35   : > { %p765_p7 = pnand %p763_p5, %p723_p13  ;;  %p772_p2 = por %p771_p0, %p770_p12 }
  0x37   : > { %p766_p9 = pneg %p765_p7 }
  0x39   : > { %p773_p1 = pnand %p772_p2, %p766_p9 }
  0x3b   : > { %776 = shalt.err (!%p773_p1)
}
  0x3c   : > { %656 = dma.hbm_to_vmem [thread:$0]  (!%p974_p11), %s1172_s4, 128, %s978_s6, [#allocation6]  }
  0x3d   : > { %s1033_s14 = sadd.s32 1, %s877_s21   ;;  %s29_s29 = sadd.s32 1, %s873_s20 }
  0x3e   : > { %s26_s15 = ssub.s32 %s877_s21, %s1033_s14  ;;  %p36_p13 = scmp.ne.s32.totalorder %s873_s20, %s869_s19 }
  0x3f   : > { %p27_p6 = scmp.eq.s32.totalorder %s26_s15, 0  ;;  %p37_p10 = scmp.eq.s32.totalorder %s877_s21, 0 }
  0x40   : > { %p1181_p3 = scmp.eq.s32.totalorder %s944_s22, 1  ;;  %p667_p7 = scmp.lt.s32.totalorder %s877_s21, 2 }
  0x41   : > { %s1049_s17 = scalar_select %p27_p6, %s873_s20, %s29_s29  }
  0x42   : > { %p1043_p5 = por %p1181_p3, %p36_p13  ;;  %p38_p9 = por %p37_p10, %p36_p13 }
  0x43   : > { %s206_s23 = sand.u32 1, %s873_s20   ;;  %s595_s6 = sshll.u32 %s877_s21, 6 }
  0x44   : > { %s1182_s16 = scalar_select %p1043_p5, 1, 0 }
  0x45   : > { %s594_s27 = sshll.u32 %s206_s23, 2  ;;  %s1056_s8 = scalar_lea.hbm %s1168_s0, %s595_s6 }
  0x46   : > { %s210_s9 = scalar_lea.vmem [#allocation2], %s594_s27  ;;  %p1060_p11 = pnand %p667_p7, %p38_p9 }
  0x47   : > { %s217_s10 = sshll.u32 %s210_s9, 4  ;;  %s207_s28 = scalar_lea.sflag [#allocation3], %s206_s23  ;;  %s1058_s10 = int_to_ptr.vmem [resolvable:$true] %s217_s10 }
  0x48   : > { %s777_s12 = scalar_lea.hbm %s1056_s8, 64  ;;  %p779_p0 = pneg %p1060_p11 }
  0x49   : > { %p778_p12 = scmp.ne.s32.totalorder %s1056_s8, %s777_s12  ;;  %s782_s15 = scalar_lea.hbm %s1168_s0, 128 }
  0x4a   : > { %p783_p13 = scmp.lt.u32.totalorder %s1056_s8, %s1168_s0  ;;  %p784_p6 = scmp.lt.u32.totalorder %s782_s15, %s777_s12 }
  0x4b   : > { %p780_p2 = pnand %p779_p0, %p778_p12  ;;  %p786_p3 = scmp.lt.u32.totalorder %s777_s12, %s1056_s8 }
  0x4c   : > { %p785_p10 = por %p784_p6, %p783_p13 }
  0x4d   : > { %p781_p1 = pneg %p780_p2 }
  0x4e   : > { %p787_p7 = por %p786_p3, %p785_p10 }
  0x50   : > { %p788_p9 = pnand %p787_p7, %p781_p1 }
  0x52   : > { %791 = shalt.err (!%p788_p9)
}
  0x53   : > { %s792_s23 = scalar_lea.vmem %s1058_s10, 64  ;;  %s883_s30 = smov [#allocation2]  }
  0x54   : > { %p793_p12 = scmp.ne.s32.totalorder %s1058_s10, %s792_s23  ;;  %s797_s7 = sshll.u32 %s883_s30, 4  ;;  %s798_s7 = int_to_ptr.vmem [resolvable:$false] %s797_s7 }
  0x55   : > { %s799_s9 = scalar_lea.vmem %s798_s7, 128  ;;  %p800_p4 = scmp.lt.s32.totalorder %s1058_s10, %s798_s7 }
  0x56   : > { %p795_p2 = pnand %p793_p12, %p779_p0  ;;  %p801_p13 = scmp.lt.s32.totalorder %s799_s9, %s792_s23 }
  0x58   : > { %p796_p5 = pneg %p795_p2  ;;  %p802_p6 = por %p801_p13, %p800_p4 }
  0x5a   : > { %p803_p10 = pnand %p802_p6, %p796_p5 }
  0x5c   : > { %806 = shalt.err (!%p803_p10)
}
  0x5d   : > { %660 = dma.hbm_to_vmem [thread:$0]  (!%p1060_p11), %s1056_s8, 64, %s1058_s10, %s207_s28  }
  0x5e   : > { %226 = sbr.rel (%p963_p8) target bundleno = 1329 (0x531), region = 40  ;;  %s1092_s12 = sand.u32 (!%p963_p8), 1, %s869_s19  }
  0x5f   : > { %s597_s13 = sshll.u32 (!%p963_p8), %s1092_s12, 2  ;;  %s229_s29 = scalar_lea.sflag (!%p963_p8), [#allocation3], %s1092_s12 }
  0x60   : > { %s232_s15 = scalar_lea.vmem (!%p963_p8), [#allocation2], %s597_s13  ;;  %p1184_p4 = scmp.ne.s32.totalorder (!%p963_p8), %s1177_s24, 0 }
  0x65   : > { %852 = dma.done.wait (%p1184_p4), %s229_s29, 64  }
  0x66   : > { %854 = vsyncadd (%p1184_p4), %s229_s29, 4294967232  ;;  %p1185_p5 = scmp.eq.s32.totalorder %s944_s22, 0 }
  0x68   : > { %856 = dma.done.wait (%p1185_p5), [#allocation6], 384   ;;  %p1186_p11 = pmov %p1185_p5 }
  0x69   : > { %v884_v0 = vmov 0.0   ;;  %vm885_vm0 = vmmov 0   ;;  %v715_v1 = vld [vmem:[#allocation5] sm:$0xff]   ;;  %v716_v2 = vld [vmem:[#allocation5 + $0x8] sm:$0xff]   ;;  %v337_v3 = vld [vmem:[#allocation7] sm:$0xff]  ;;  %s886_s24 = smov 48   ;;  %v415_v27 = vlaneseq }
  0x6a   : > { %858 = vsyncadd (%p1186_p11), [#allocation6], 4294966912  ;;  %618 = vmatprep.subr.bf16.mxu0 %v884_v0  ;;  %622 = vmatprep.mubr.msk.bf16.mxu0 %vm885_vm0, %v884_v0  ;;  %v336_v4 = vld [vmem:[%s1171_s3] sm:$0xff]  ;;  %vm292_vm1 = vcmask 261120   ;;  %s887_s10 = smov 32   ;;  %s888_s27 = smov 112  }
  0x6b   : > { %626 = vmatprep.subr.bf16.mxu1 %v884_v0  ;;  %628 = vmatprep.mubr.msk.bf16.mxu1 %vm885_vm0, %v884_v0  ;;  %v268_v5 = vld [vmem:[%s232_s15] sm:$0xf]  ;;  %s889_s6 = smov 16   ;;  %s890_s23 = smov 96   ;;  %vm368_vm2 = vcmask 130048   ;;  %v416_v28 = vshrl.u32 %v415_v27, 7 }
  0x6c   : > { %619 = vmatpush3.bf16.msra.mxu0 %v715_v1  ;;  %354 = vrot.lane.b32.xlu0 %v337_v3, %s886_s24  ;;  %v601_v6 = vld [vmem:[%s1170_s2] ss:$0 sm:$0xff]  ;;  %v418_v29 = vand.u32 127, %v415_v27  ;;  %vm421_vm4 = vcmask 64512   ;;  %s891_s30 = smov 64   ;;  %vm441_vm5 = vcmask 1043456  }
  0x6d   : > { %620 = vmatprep.subr.bf16.mxu0 %v884_v0  ;;  %s600_s7 = sshll.u32 %s1092_s12, 3  ;;  %s608_s9 = sshll.u32 %s944_s22, 7 }
  0x6e   : > { %vm419_vm3 = vcmp.ge.s32.totalorder %v416_v28, %v418_v29  ;;  %s266_s13 = scalar_lea.vmem [#allocation8], %s600_s7  ;;  %s1123_s26 = scalar_lea.hbm %s1173_s5, %s608_s9 }
  0x6f   : > { %s500_s29 = sshll.u32 %s266_s13, 4  ;;  %s487_s8 = scalar_lea.sflag [#allocation4], %s1092_s12  ;;  %s1125_s29 = int_to_ptr.vmem [resolvable:$true] %s500_s29 }
  0x70   : > { %621 = vmatpush3.bf16.msra.mxu0 %v716_v2  ;;  %350 = vrot.lane.b32.xlu0 %v336_v4, %s887_s10  ;;  %s807_s10 = scalar_lea.vmem %s1125_s29, 128  ;;  %p1187_p0 = scmp.ne.s32.totalorder %s1182_s16, 0 }
  0x71   : > { %632 = vmatprep.subr.bf16.mxu0 %v884_v0  ;;  %p808_p8 = scmp.ne.s32.totalorder %s1125_s29, %s807_s10  ;;  %s892_s22 = smov [#allocation8]  }
  0x72   : > { %s811_s11 = sshll.u32 %s892_s22, 4  ;;  %s812_s11 = int_to_ptr.vmem [resolvable:$false] %s811_s11 }
  0x73   : > { %623 = vmatmul.mubr.msk.bf16.vlgmr.msra.gmra.mrb[0].mxu0 %vm292_vm1, %v268_v5  ;;  %p809_p1 = pnand %p808_p8, %p1187_p0  ;;  %s813_s28 = scalar_lea.vmem %s812_s11, 256 }
  0x74   : > { %634 = vmatprep.mubr.msk.bf16.mxu0 %vm885_vm0, %v884_v0  ;;  %p814_p7 = scmp.lt.s32.totalorder %s1125_s29, %s812_s11  ;;  %p815_p9 = scmp.lt.s32.totalorder %s813_s28, %s807_s10 }
  0x75   : > { %p810_p3 = pneg %p809_p1 }
  0x76   : > { %p816_p12 = por %p815_p9, %p814_p7 }
  0x78   : > { %p817_p2 = pnand %p816_p12, %p810_p3 }
  0xde   : > { %v355_v10 = vpop.permute.xlu0 %354 }
  0xe2   : > { %v351_v14 = vpop.permute.xlu0 %350 }
 0x146   : > { %v330_v7 = vpop.f32.mrb[0].mxu0 }
 0x147   : > { %v331_v8 = vadd.f32 %v601_v6, %v330_v7  ;;  %v624_v9 = vpop.f32.mrb[1].mxu0 }
 0x148   : > { %v333_v11 = vpop.f32.mrb[2].mxu0 }
 0x149   : > { %v625_v12 = vpop.f32.mrb[3].mxu0  ;;  %v357_v13 = vmul.f32 %v355_v10, %v331_v8  ;;  %v353_v15 = vmul.f32 %v351_v14, %v331_v8  ;;  %v338_v22 = vmul.f32 %v336_v4, %v331_v8  ;;  %v434_v36 = vpack.c.bf16 %v331_v8, %v331_v8 }
 0x14b   : > { %359 = vrot.lane.b32.xlu1 %v357_v13, %s888_s27 }
 0x14f   : > { %340 = vrot.lane.b32.xlu1 %v337_v3, %s889_s6 }
 0x1bd   : > { %v360_v16 = vpop.permute.xlu1 %359 }
 0x1be   : > { %v362_v17 = vadd.f32 %v360_v16, %v353_v15 }
 0x1c0   : > { %v364_v18 = vpack.c.bf16 %v362_v17, %v362_v17 }
 0x1c1   : > { %v341_v19 = vpop.permute.xlu1 %340 }
 0x1c2   : > { %v343_v20 = vmul.f32 %v341_v19, %v331_v8  ;;  %366 = vrot.lane.b32.xlu0 %v364_v18, %s890_s23 }
 0x1c4   : > { %345 = vrot.lane.b32.xlu1 %v343_v20, %s888_s27 }
 0x234   : > { %v367_v21 = vpop.permute.xlu0 %366 }
 0x235   : > { %v373_v23 = vsel %vm368_vm2, %v367_v21, 0 }
 0x236   : > { %v346_v24 = vpop.permute.xlu1 %345  ;;  %627 = vmatpush3.bf16.xpose.msra.mxu1 %v373_v23 }
 0x237   : > { %v348_v25 = vadd.f32 %v346_v24, %v338_v22 }
 0x239   : > { %v363_v26 = vpack.c.bf16 %v348_v25, %v348_v25 }
 0x23d   : > { %629 = vmatmul.mubr.msk.bf16.vlgmr.msra.gmra.mrb[0].mxu1 %vm368_vm2, %v363_v26 }
 0x310   : > { %v409_v30 = vpop.f32.mrb[0].mxu1 }
 0x311   : > { %v420_v31 = vsel %vm419_vm3, %v409_v30, -1e+30  ;;  %v630_v32 = vpop.f32.mrb[1].mxu1 }
 0x312   : > { %v412_v33 = vpop.f32.mrb[2].mxu1  ;;  %v422_v34 = vsel %vm421_vm4, %v420_v31, -inf }
 0x313   : > { %423 = vmax.xlane.f32.xlu0 %v422_v34  ;;  %v631_v35 = vpop.f32.mrb[3].mxu1 }
 0x329   : > { %436 = vrot.lane.b32.xlu0 %v434_v36, %s891_s30 }
 0x3a0   : > { %v424_v37 = vpop.xlane.xlu0 %423 }
 0x3a1   : > { %v425_v38 = vsub.f32 %v420_v31, %v424_v37 }
 0x3a3   : > { %v426_v39 = vmul.f32 1.442695, %v425_v38 }
 0x3a4   : > { %v437_v40 = vpop.permute.xlu0 %436 }
 0x3a5   : > { %717 = vpow2.f32 %v426_v39  ;;  %v443_v41 = vsel %vm441_vm5, %v437_v40, 0 }
 0x3a6   : > { %633 = vmatpush3.bf16.msra.mxu0 %v443_v41 }
 0x3af   : > { %v718_v42 = vpop.eup %717 }
 0x3b0   : > { %v428_v43 = vsel %vm421_vm4, %v718_v42, 0.0 }
 0x3b1   : > { %429 = vadd.xlane.f32.xlu1 %v428_v43 }
 0x43e   : > { %v430_v44 = vpop.xlane.xlu1 %429 }
 0x43f   : > { %719 = vrcp.f32 %v430_v44 }
 0x449   : > { %v720_v45 = vpop.eup %719 }
 0x44a   : > { %v432_v46 = vmul.f32 %v720_v45, %v718_v42 }
 0x44c   : > { %v433_v47 = vpack.c.bf16 %v432_v46, %v432_v46 }
 0x44e   : > { %635 = vmatmul.mubr.msk.bf16.vlgmr.msra.gmra.mrb[4].mxu0 %vm421_vm4, %v433_v47 }
 0x521   : > { %v479_v48 = vpop.f32.mrb[4].mxu0 }
 0x522   : > { %485 = vst.msk [vmem:[%s266_s13] sm:$0xff] %vm368_vm2, %v479_v48  ;;  %v636_v49 = vpop.f32.mrb[5].mxu0 }
 0x523   : > { %v482_v50 = vpop.f32.mrb[6].mxu0 }
 0x524   : > { %820 = shalt.err (!%p817_p2)
}
 0x525   : > { %s821_s12 = scalar_lea.hbm %s1123_s26, 128  ;;  %s825_s23 = scalar_lea.hbm %s1173_s5, 256 }
 0x526   : > { %p822_p13 = scmp.ne.s32.totalorder %s1123_s26, %s821_s12  ;;  %p826_p4 = scmp.lt.u32.totalorder %s1123_s26, %s1173_s5 }
 0x527   : > { %p827_p5 = scmp.lt.u32.totalorder %s825_s23, %s821_s12  ;;  %p829_p8 = scmp.lt.u32.totalorder %s821_s12, %s1123_s26 }
 0x528   : > { %p823_p6 = pnand %p822_p13, %p1187_p0 }
 0x529   : > { %p828_p11 = por %p827_p5, %p826_p4 }
 0x52a   : > { %p824_p10 = pneg %p823_p6 }
 0x52b   : > { %p830_p1 = por %p829_p8, %p828_p11 }
 0x52d   : > { %p831_p3 = pnand %p830_p1, %p824_p10 }
 0x52f   : > { %834 = shalt.err (!%p831_p3)
}
 0x530   : > { %648 = dma.vmem_to_hbm [thread:$0]  (%p1187_p0), %s1125_s29, 128, %s1123_s26, %s487_s8   ;;  %v637_v51 = vpop.f32.mrb[7].mxu0 }
 0x531 PF: > { %s512_s9 = sand.u32 1, %s865_s18   ;;  %p1188_p7 = scmp.ne.s32.totalorder %s1178_s25, 0 }
 0x532   : > { %p1189_p9 = scmp.ge.s32.totalorder %s877_s21, 2  ;;  %s513_s13 = scalar_lea.sflag [#allocation4], %s512_s9 }
 0x534   : > { %p662_p12 = pnand %p1189_p9, %p1188_p7 }
 0x536   : > { %860 = dma.done.wait (!%p662_p12), %s513_s13, 128  }
 0x537   : > { %862 = vsyncadd (!%p662_p12), %s513_s13, 4294967168  ;;  %p19_p2 = scmp.ge.s32.totalorder %s1033_s14, 4   ;;  %s1190_s18 = smov %s869_s19 }
 0x538   : > { %s1191_s19 = smov %s873_s20  ;;  %s1192_s20 = smov %s1049_s17 }
 0x539   : > { %s1193_s21 = smov %s1033_s14  ;;  %21 = sbr.rel (!%p19_p2) target bundleno = 6 (0x6), region = 93 }
 0x540   :  { %518 = vsyncpa [#allocation3], 1 }
 0x541   :  { %520 = vsyncpa [#allocation3 + $0x1], 1 }
 0x542   :  { %521 = vsyncpa [#allocation6], 1 }
 0x543   :  { %522 = vsyncpa [#allocation4], 1 }
 0x544   :  { %524 = vsyncpa [#allocation4 + $0x1], 1 }

</bundles_post_ra>
